<compile_context>
chip_gen: v5e
topology: v5e:2x2
jax: 0.10.0
libtpu: 0.0.40
codegen_flags: <defaults>
</compile_context>

<pallas_src>
import math

import jax
import jax.numpy as jnp
from jax.experimental import pallas as pl
from jax.experimental.pallas import tpu as pltpu

_LOG_SQRT_2PI = 0.5 * math.log(2.0 * math.pi)
_LOG_HALF = math.log(0.5)   # log(Phi(inf) - Phi(0)): truncation constant


def _mlp_kernel(x_ref, bond_ref, feat_ref, w1x_ref, w1b_ref, w1f_ref, b1_ref,
                logf_ref, sigma_ref, out_ref, acc_ref):
    k = pl.program_id(2)

    @pl.when(k == 0)
    def _():
        acc_ref[...] = jnp.zeros_like(acc_ref)

    # MXU partial products against the matching row-slices of W1 (bf16 in,
    # f32 accumulate).
    acc_ref[...] += jnp.dot(x_ref[...], w1x_ref[...],
                            preferred_element_type=jnp.float32)
    acc_ref[...] += jnp.dot(bond_ref[...], w1b_ref[...],
                            preferred_element_type=jnp.float32)

    @pl.when(k == pl.num_programs(2) - 1)
    def _():
        # Tiny feature segment (ftr_dim rows of W1) + bias: VPU broadcast
        # mul-adds instead of a K=2 MXU matmul.
        feat = feat_ref[...]                          # (TB, FTR)  f32
        w1f = w1f_ref[...]                            # (FTR, TN)  f32
        h = acc_ref[...] + b1_ref[...]
        for j in range(feat_ref.shape[1]):            # static, tiny
            h = h + feat[:, j:j + 1] * w1f[j:j + 1, :]

        mean = logf_ref[...] - h                      # (TB, TN)
        kern = -0.5 * mean * mean - _LOG_SQRT_2PI - _LOG_HALF
        inv_sigma = pl.reciprocal(sigma_ref[...], approx=True)   # (TB, 1), EUP
        out_ref[...] = 1.0 - jnp.exp(kern * inv_sigma)


def _round_up(v, m):
    return ((v + m - 1) // m) * m


def _pick_tile(dim, align, target):
    """Largest tile <= target that divides dim and is align-aligned, else full dim."""
    if dim <= target:
        return dim
    t = (target // align) * align
    while t >= align:
        if dim % t == 0:
            return t
        t -= align
    return dim


def _forward_dense(frame, x, bond, feature, params):
    b, t, e = x.shape
    c = bond.shape[-1]
    ftr = feature.shape[-1]
    k1 = t * e                   # x segment rows of W1
    k2 = t * e * c               # bond segment rows of W1
    n = e * e                    # ff1 output width (== t*e since t == e)

    # ---- wrapper glue: pure layout + tiny scalar path (no concat copy) ------
    x_flat = x.reshape(b, k1).astype(jnp.bfloat16)
    bond_flat = bond.reshape(b, k2).astype(jnp.bfloat16)
    feat32 = feature.astype(jnp.float32)
    logf = jnp.log(frame).astype(jnp.float32).reshape(b, 1)
    sigma = 10.0 * jax.nn.softplus(
        feat32 @ params["wsig"].astype(jnp.float32)
        + params["bsig"].astype(jnp.float32)
    ).reshape(b, 1)

    # W1 row segments, lane-padded to a multiple of 128 (lane-dense stores);
    # padded columns are sliced off below.
    n_pad = _round_up(n, 128)
    w1 = params["w1"].astype(jnp.float32)
    b1 = params["b1"].astype(jnp.float32).reshape(1, n)
    pad = ((0, 0), (0, n_pad - n))
    w1x = jnp.pad(w1[:k1], pad).astype(jnp.bfloat16)
    w1b = jnp.pad(w1[k1:k1 + k2], pad).astype(jnp.bfloat16)
    w1f = jnp.pad(w1[k1 + k2:], pad)                   # (ftr, n_pad) f32
    b1p = jnp.pad(b1, pad)                             # (1,   n_pad) f32

    # ---- tiling (sized to stay well under the per-generation VMEM budget) ---
    tb = _pick_tile(b, 8, 128)
    tn = _pick_tile(n_pad, 128, 512)
    tkx = _pick_tile(k1, 128, 512)
    tkb = tkx * c
    nb, nn, nk = b // tb, n_pad // tn, k1 // tkx

    w1b_spec = pl.BlockSpec((tkb, tn), lambda i, j, k: (k, j))
    if nk >= 3:
        # deeper buffering on the dominant weight stream when the K loop is real
        w1b_spec = pl.BlockSpec((tkb, tn), lambda i, j, k: (k, j),
                                pipeline_mode=pl.Buffered(3))

    cost = pl.CostEstimate(
        flops=2 * b * (k1 + k2 + ftr) * n_pad + 6 * b * n_pad,
        transcendentals=b * n_pad + b,
        bytes_accessed=((k1 + k2) * n_pad * 2 + b * (k1 + k2) * 2
                        + (ftr + 1) * n_pad * 4 + b * (ftr + 2) * 4
                        + b * n_pad * 4),
    )

    st_pad = pl.pallas_call(
        _mlp_kernel,
        out_shape=jax.ShapeDtypeStruct((b, n_pad), jnp.float32),
        grid_spec=pltpu.PrefetchScalarGridSpec(
            num_scalar_prefetch=0,
            grid=(nb, nn, nk),
            in_specs=[
                pl.BlockSpec((tb, tkx), lambda i, j, k: (i, k)),   # x     bf16
                pl.BlockSpec((tb, tkb), lambda i, j, k: (i, k)),   # bond  bf16
                pl.BlockSpec((tb, ftr), lambda i, j, k: (i, 0)),   # feature f32
                pl.BlockSpec((tkx, tn), lambda i, j, k: (k, j)),   # w1x   bf16
                w1b_spec,                                          # w1b   bf16
                pl.BlockSpec((ftr, tn), lambda i, j, k: (0, j)),   # w1f   f32
                pl.BlockSpec((1, tn), lambda i, j, k: (0, j)),     # b1    f32
                pl.BlockSpec((tb, 1), lambda i, j, k: (i, 0)),     # log(frame)
                pl.BlockSpec((tb, 1), lambda i, j, k: (i, 0)),     # sigma
            ],
            out_specs=pl.BlockSpec((tb, tn), lambda i, j, k: (i, j)),
            scratch_shapes=[pltpu.VMEM((tb, tn), jnp.float32)],
        ),
        compiler_params=pltpu.CompilerParams(
            dimension_semantics=("parallel", "parallel", "arbitrary"),
            vmem_limit_bytes=48 * 1024 * 1024,
        ),
        cost_estimate=cost,
    )(x_flat, bond_flat, feat32, w1x, w1b, w1f, b1p, logf, sigma)

    return st_pad[:, :n].reshape(b, t, e)


_forward_dense_jit = jax.jit(_forward_dense)


def mlp_forward(frame, x, bond, feature, mask, params):
    S_t = _forward_dense_jit(frame, x, bond, feature, params)
    # TODO(synk): boolean-mask gather has a data-dependent output shape, so it
    # stays outside the kernel/jit, exactly like torch's S_t[mask > 0].
    return S_t[mask > 0]


def init_params(key, ftr_dim, emb, contact_type_dim):
    feature_dim = emb * emb + emb * emb * contact_type_dim + ftr_dim
    k1, k2, k3, k4 = jax.random.split(key, 4)
    s1 = 1.0 / math.sqrt(feature_dim)
    s2 = 1.0 / math.sqrt(ftr_dim)
    return {
        # ff1: Linear(feature_dim, emb*emb)
        "w1": jax.random.uniform(k1, (feature_dim, emb * emb), jnp.float32, -s1, s1),
        "b1": jax.random.uniform(k2, (1, emb * emb), jnp.float32, -s1, s1),
        # env_effect_sigma: Linear(ftr_dim, 1)
        "wsig": jax.random.uniform(k3, (ftr_dim, 1), jnp.float32, -s2, s2),
        "bsig": jax.random.uniform(k4, (1, 1), jnp.float32, -s2, s2),
    }


if __name__ == "__main__":
    B, EMB, C, FTR = 2, 8, 10, 2          # t == e == emb (required by the module)
    T = E = EMB

    key = jax.random.PRNGKey(0)
    kp, kf, kx, kb, kfe, km = jax.random.split(key, 6)

    params = init_params(kp, FTR, EMB, C)

    frame = jax.random.uniform(kf, (B,), jnp.float32, 1.0, 10.0)   # positive (log)
    x = jax.random.normal(kx, (B, T, E), jnp.float32)
    bond = jax.random.normal(kb, (B, T, E, C), jnp.float32)
    feature = jax.random.normal(kfe, (B, FTR), jnp.float32)
    mask = jax.random.bernoulli(km, 0.5, (B, T, E)).astype(jnp.int32)

    out = mlp_forward(frame, x, bond, feature, mask, params)
    jax.block_until_ready(out)
    assert out.ndim == 1 and out.shape[0] == int(jnp.sum(mask > 0))
    assert bool(jnp.all(jnp.isfinite(out)))
    print("KERNEL_OK")
</pallas_src>

<mosaic_0001>
module attributes {stable_mosaic.version = 11 : i64} {
  func.func @_mlp_kernel(%arg0: i32, %arg1: i32, %arg2: i32, %arg3: memref<2x64xbf16, #tpu.memory_space<vmem>>, %arg4: memref<2x640xbf16, #tpu.memory_space<vmem>>, %arg5: memref<2x2xf32, #tpu.memory_space<vmem>>, %arg6: memref<64x128xbf16, #tpu.memory_space<vmem>>, %arg7: memref<640x128xbf16, #tpu.memory_space<vmem>>, %arg8: memref<2x128xf32, #tpu.memory_space<vmem>>, %arg9: memref<1x128xf32, #tpu.memory_space<vmem>>, %arg10: memref<2x1xf32, #tpu.memory_space<vmem>>, %arg11: memref<2x1xf32, #tpu.memory_space<vmem>>, %arg12: memref<2x128xf32, #tpu.memory_space<vmem>>, %arg13: memref<2x128xf32, #tpu.memory_space<vmem>>) attributes {dimension_semantics = [#tpu.dimension_semantics<parallel>, #tpu.dimension_semantics<parallel>, #tpu.dimension_semantics<arbitrary>], iteration_bounds = array<i64: 1, 1, 1>, scalar_prefetch = 0 : i64, scratch_operands = 1 : i64, tpu.core_type = #tpu.core_type<tc>, window_params = [{transform_indices = @transform_0, window_bounds = array<i64: 2, 64>}, {transform_indices = @transform_1, window_bounds = array<i64: 2, 640>}, {transform_indices = @transform_2, window_bounds = array<i64: 2, 2>}, {transform_indices = @transform_3, window_bounds = array<i64: 64, 128>}, {transform_indices = @transform_4, window_bounds = array<i64: 640, 128>}, {transform_indices = @transform_5, window_bounds = array<i64: 2, 128>}, {transform_indices = @transform_6, window_bounds = array<i64: 1, 128>}, {transform_indices = @transform_7, window_bounds = array<i64: 2, 1>}, {transform_indices = @transform_8, window_bounds = array<i64: 2, 1>}, {transform_indices = @transform_9, window_bounds = array<i64: 2, 128>}]} {
    %c0_i32 = arith.constant 0 : i32
    %0 = arith.cmpi eq, %arg2, %c0_i32 : i32
    %1 = arith.extui %0 : i1 to i32
    %c0_i32_0 = arith.constant 0 : i32
    %2 = arith.cmpi ne, %1, %c0_i32_0 : i32
    scf.if %2 {
      %cst_19 = arith.constant 0.000000e+00 : f32
      %18 = vector.broadcast %cst_19 : f32 to vector<2x128xf32>
      %c0_20 = arith.constant 0 : index
      %c0_21 = arith.constant 0 : index
      %19 = vector.load %arg13[%c0_20, %c0_21] : memref<2x128xf32, #tpu.memory_space<vmem>>, vector<2x128xf32>
      tpu.vector_store %arg13[%c0_20, %c0_21], %18 {strides = array<i32>} : memref<2x128xf32, #tpu.memory_space<vmem>>, vector<2x128xf32>,
    } else {
    }
    %c0 = arith.constant 0 : index
    %c0_1 = arith.constant 0 : index
    %3 = vector.load %arg13[%c0, %c0_1] : memref<2x128xf32, #tpu.memory_space<vmem>>, vector<2x128xf32>
    %c0_2 = arith.constant 0 : index
    %c0_3 = arith.constant 0 : index
    %4 = vector.load %arg3[%c0_2, %c0_3] : memref<2x64xbf16, #tpu.memory_space<vmem>>, vector<2x64xbf16>
    %c0_4 = arith.constant 0 : index
    %c0_5 = arith.constant 0 : index
    %5 = vector.load %arg6[%c0_4, %c0_5] : memref<64x128xbf16, #tpu.memory_space<vmem>>, vector<64x128xbf16>
    %cst = arith.constant dense<0.000000e+00> : vector<2x128xf32>
    %6 = tpu.matmul %4, %5, %cst {dimension_numbers = #tpu.dot_dimension_numbers<[1], [0], [0], [1], [0, 0, 1, 1], [], []>} : vector<2x64xbf16>, vector<64x128xbf16>, vector<2x128xf32> -> vector<2x128xf32>
    %7 = arith.addf %3, %6 : vector<2x128xf32>
    %c0_6 = arith.constant 0 : index
    %c0_7 = arith.constant 0 : index
    %8 = vector.load %arg13[%c0_6, %c0_7] : memref<2x128xf32, #tpu.memory_space<vmem>>, vector<2x128xf32>
    tpu.vector_store %arg13[%c0_6, %c0_7], %7 {strides = array<i32>} : memref<2x128xf32, #tpu.memory_space<vmem>>, vector<2x128xf32>,
    %c0_8 = arith.constant 0 : index
    %c0_9 = arith.constant 0 : index
    %9 = vector.load %arg13[%c0_8, %c0_9] : memref<2x128xf32, #tpu.memory_space<vmem>>, vector<2x128xf32>
    %c0_10 = arith.constant 0 : index
    %c0_11 = arith.constant 0 : index
    %10 = vector.load %arg4[%c0_10, %c0_11] : memref<2x640xbf16, #tpu.memory_space<vmem>>, vector<2x640xbf16>
    %c0_12 = arith.constant 0 : index
    %c0_13 = arith.constant 0 : index
    %11 = vector.load %arg7[%c0_12, %c0_13] : memref<640x128xbf16, #tpu.memory_space<vmem>>, vector<640x128xbf16>
    %cst_14 = arith.constant dense<0.000000e+00> : vector<2x128xf32>
    %12 = tpu.matmul %10, %11, %cst_14 {dimension_numbers = #tpu.dot_dimension_numbers<[1], [0], [0], [1], [0, 0, 1, 1], [], []>} : vector<2x640xbf16>, vector<640x128xbf16>, vector<2x128xf32> -> vector<2x128xf32>
    %13 = arith.addf %9, %12 : vector<2x128xf32>
    %c0_15 = arith.constant 0 : index
    %c0_16 = arith.constant 0 : index
    %14 = vector.load %arg13[%c0_15, %c0_16] : memref<2x128xf32, #tpu.memory_space<vmem>>, vector<2x128xf32>
    tpu.vector_store %arg13[%c0_15, %c0_16], %13 {strides = array<i32>} : memref<2x128xf32, #tpu.memory_space<vmem>>, vector<2x128xf32>,
    %c0_i32_17 = arith.constant 0 : i32
    %15 = arith.cmpi eq, %arg2, %c0_i32_17 : i32
    %16 = arith.extui %15 : i1 to i32
    %c0_i32_18 = arith.constant 0 : i32
    %17 = arith.cmpi ne, %16, %c0_i32_18 : i32
    scf.if %17 {
      %c0_19 = arith.constant 0 : index
      %c0_20 = arith.constant 0 : index
      %18 = vector.load %arg5[%c0_19, %c0_20] : memref<2x2xf32, #tpu.memory_space<vmem>>, vector<2x2xf32>
      %c0_21 = arith.constant 0 : index
      %c0_22 = arith.constant 0 : index
      %19 = vector.load %arg8[%c0_21, %c0_22] : memref<2x128xf32, #tpu.memory_space<vmem>>, vector<2x128xf32>
      %c0_23 = arith.constant 0 : index
      %c0_24 = arith.constant 0 : index
      %20 = vector.load %arg13[%c0_23, %c0_24] : memref<2x128xf32, #tpu.memory_space<vmem>>, vector<2x128xf32>
      %c0_25 = arith.constant 0 : index
      %c0_26 = arith.constant 0 : index
      %21 = vector.load %arg9[%c0_25, %c0_26] : memref<1x128xf32, #tpu.memory_space<vmem>>, vector<1x128xf32>
      %22 = vector.broadcast %21 : vector<1x128xf32> to vector<2x128xf32>
      %23 = arith.addf %20, %22 : vector<2x128xf32>
      %24 = vector.extract_strided_slice %18 {offsets = [0, 0], sizes = [2, 1], strides = [1, 1]} : vector<2x2xf32> to vector<2x1xf32>
      %25 = vector.extract_strided_slice %19 {offsets = [0, 0], sizes = [1, 128], strides = [1, 1]} : vector<2x128xf32> to vector<1x128xf32>
      %26 = vector.broadcast %24 : vector<2x1xf32> to vector<2x128xf32>
      %27 = vector.broadcast %25 : vector<1x128xf32> to vector<2x128xf32>
      %28 = arith.mulf %26, %27 : vector<2x128xf32>
      %29 = arith.addf %23, %28 : vector<2x128xf32>
      %30 = vector.extract_strided_slice %18 {offsets = [0, 1], sizes = [2, 1], strides = [1, 1]} : vector<2x2xf32> to vector<2x1xf32>
      %31 = vector.extract_strided_slice %19 {offsets = [1, 0], sizes = [1, 128], strides = [1, 1]} : vector<2x128xf32> to vector<1x128xf32>
      %32 = vector.broadcast %30 : vector<2x1xf32> to vector<2x128xf32>
      %33 = vector.broadcast %31 : vector<1x128xf32> to vector<2x128xf32>
      %34 = arith.mulf %32, %33 : vector<2x128xf32>
      %35 = arith.addf %29, %34 : vector<2x128xf32>
      %c0_27 = arith.constant 0 : index
      %c0_28 = arith.constant 0 : index
      %36 = vector.load %arg10[%c0_27, %c0_28] : memref<2x1xf32, #tpu.memory_space<vmem>>, vector<2x1xf32>
      %37 = vector.broadcast %36 : vector<2x1xf32> to vector<2x128xf32>
      %38 = arith.subf %37, %35 : vector<2x128xf32>
      %cst_29 = arith.constant -5.000000e-01 : f32
      %39 = vector.broadcast %cst_29 : f32 to vector<2x128xf32>
      %40 = arith.mulf %39, %38 : vector<2x128xf32>
      %41 = arith.mulf %40, %38 : vector<2x128xf32>
      %cst_30 = arith.constant 0.918938517 : f32
      %42 = vector.broadcast %cst_30 : f32 to vector<2x128xf32>
      %43 = arith.subf %41, %42 : vector<2x128xf32>
      %cst_31 = arith.constant -0.693147182 : f32
      %44 = vector.broadcast %cst_31 : f32 to vector<2x128xf32>
      %45 = arith.subf %43, %44 : vector<2x128xf32>
      %c0_32 = arith.constant 0 : index
      %c0_33 = arith.constant 0 : index
      %46 = vector.load %arg11[%c0_32, %c0_33] : memref<2x1xf32, #tpu.memory_space<vmem>>, vector<2x1xf32>
      %47 = tpu.reciprocal %46 {approx = true} : vector<2x1xf32> -> vector<2x1xf32>
      %48 = vector.broadcast %47 : vector<2x1xf32> to vector<2x128xf32>
      %49 = arith.mulf %45, %48 : vector<2x128xf32>
      %50 = math.exp %49 : vector<2x128xf32>
      %cst_34 = arith.constant 1.000000e+00 : f32
      %51 = vector.broadcast %cst_34 : f32 to vector<2x128xf32>
      %52 = arith.subf %51, %50 : vector<2x128xf32>
      %c0_35 = arith.constant 0 : index
      %c0_36 = arith.constant 0 : index
      %53 = vector.load %arg12[%c0_35, %c0_36] : memref<2x128xf32, #tpu.memory_space<vmem>>, vector<2x128xf32>
      tpu.vector_store %arg12[%c0_35, %c0_36], %52 {strides = array<i32>} : memref<2x128xf32, #tpu.memory_space<vmem>>, vector<2x128xf32>,
    } else {
    }
    return
  }
  func.func @transform_0(%arg0: i32, %arg1: i32, %arg2: i32) -> (i32, i32) {
    %c0_i32 = arith.constant 0 : i32
    return %arg0, %arg2 : i32, i32
  }
  func.func @transform_1(%arg0: i32, %arg1: i32, %arg2: i32) -> (i32, i32) {
    %c0_i32 = arith.constant 0 : i32
    return %arg0, %arg2 : i32, i32
  }
  func.func @transform_2(%arg0: i32, %arg1: i32, %arg2: i32) -> (i32, i32) {
    %c0_i32 = arith.constant 0 : i32
    %c0_i32_0 = arith.constant 0 : i32
    return %arg0, %c0_i32 : i32, i32
  }
  func.func @transform_3(%arg0: i32, %arg1: i32, %arg2: i32) -> (i32, i32) {
    %c0_i32 = arith.constant 0 : i32
    return %arg2, %arg1 : i32, i32
  }
  func.func @transform_4(%arg0: i32, %arg1: i32, %arg2: i32) -> (i32, i32) {
    %c0_i32 = arith.constant 0 : i32
    return %arg2, %arg1 : i32, i32
  }
  func.func @transform_5(%arg0: i32, %arg1: i32, %arg2: i32) -> (i32, i32) {
    %c0_i32 = arith.constant 0 : i32
    %c0_i32_0 = arith.constant 0 : i32
    return %c0_i32, %arg1 : i32, i32
  }
  func.func @transform_6(%arg0: i32, %arg1: i32, %arg2: i32) -> (i32, i32) {
    %c0_i32 = arith.constant 0 : i32
    %c0_i32_0 = arith.constant 0 : i32
    return %c0_i32, %arg1 : i32, i32
  }
  func.func @transform_7(%arg0: i32, %arg1: i32, %arg2: i32) -> (i32, i32) {
    %c0_i32 = arith.constant 0 : i32
    %c0_i32_0 = arith.constant 0 : i32
    return %arg0, %c0_i32 : i32, i32
  }
  func.func @transform_8(%arg0: i32, %arg1: i32, %arg2: i32) -> (i32, i32) {
    %c0_i32 = arith.constant 0 : i32
    %c0_i32_0 = arith.constant 0 : i32
    return %arg0, %c0_i32 : i32, i32
  }
  func.func @transform_9(%arg0: i32, %arg1: i32, %arg2: i32) -> (i32, i32) {
    %c0_i32 = arith.constant 0 : i32
    return %arg0, %arg1 : i32, i32
  }
}

</mosaic_0001>

<bundles_post_ra>
// kernel: _forward_dense.1
= control target key start
LH: loop header
LB: loop body
LE: loop exit
PB: predicated region body
PF: predicated region fallthrough
CT: control target
= control target key end

     0   :  { %vm72_vm0 = vcmask 523264   ;;  %v780_v40 = vmov 0.0   ;;  %v781_v43 = vmov 0   ;;  %v782_v51 = vmov 1   ;;  %s989_s4 = inlined_call_operand.vmem [shape: bf16[640,128], index: 4, kind: input, shape index: {}]   ;;  %s990_s3 = inlined_call_operand.vmem [shape: bf16[64,128], index: 3, kind: input, shape index: {}]   ;;  %s991_s1 = inlined_call_operand.vmem [shape: bf16[2,640], index: 1, kind: input, shape index: {}]   ;;  %s992_s0 = inlined_call_operand.vmem [shape: bf16[2,64], index: 0, kind: input, shape index: {}]   ;;  %s993_s2 = inlined_call_operand.vmem [shape: f32[2,2], index: 2, kind: input, shape index: {}]   ;;  %s994_s8 = inlined_call_operand.vmem [shape: f32[2,1], index: 8, kind: input, shape index: {}]   ;;  %s995_s7 = inlined_call_operand.vmem [shape: f32[2,1], index: 7, kind: input, shape index: {}]   ;;  %s996_s6 = inlined_call_operand.vmem [shape: f32[1,128], index: 6, kind: input, shape index: {}]   ;;  %s997_s5 = inlined_call_operand.vmem [shape: f32[2,128], index: 5, kind: input, shape index: {}]   ;;  %s998_s9 = inlined_call_operand.vmem [shape: f32[2,128], index: 9, kind: output, shape index: {}]  }
   0x1   :  { %v735_v0 = vld [vmem:[%s989_s4 + $0x38] sm:$0xff]  ;;  %v734_v3 = vld [vmem:[%s989_s4 + $0x30] sm:$0xff]  ;;  %v733_v8 = vld [vmem:[%s989_s4 + $0x28] sm:$0xff]  ;;  %37 = vst [vmem:[#allocation2] sm:$0x3] %v780_v40  ;;  %771 = vset.pattern.permute.xlu0 %v781_v43  ;;  %773 = vset.pattern.permute.xlu1 %v781_v43 }
   0x2   :  { %v727_v1 = vld [vmem:[%s990_s3 + $0x18] sm:$0xff]  ;;  %425 = vmatpush.bf16.msra.mxu1 %v735_v0  ;;  %v726_v4 = vld [vmem:[%s990_s3 + $0x10] sm:$0xff]  ;;  %v725_v9 = vld [vmem:[%s990_s3 + $0x8] sm:$0xff] }
   0x3   :  { %v743_v2 = vld [vmem:[%s989_s4 + $0x78] sm:$0xff]  ;;  %80 = vmatpush.bf16.msra.mxu0 %v727_v1  ;;  %v742_v6 = vld [vmem:[%s989_s4 + $0x70] sm:$0xff]  ;;  %v741_v10 = vld [vmem:[%s989_s4 + $0x68] sm:$0xff] }
   0x4   :  { %v751_v5 = vld [vmem:[%s989_s4 + $0xb8] sm:$0xff]  ;;  %438 = vmatpush.bf16.msra.mxu2 %v743_v2  ;;  %v750_v7 = vld [vmem:[%s989_s4 + $0xb0] sm:$0xff]  ;;  %v749_v11 = vld [vmem:[%s989_s4 + $0xa8] sm:$0xff] }
   0x5   :  { %451 = vmatpush.bf16.msra.mxu3 %v751_v5  ;;  %v732_v12 = vld [vmem:[%s989_s4 + $0x20] sm:$0xff]  ;;  %v759_v14 = vld [vmem:[%s989_s4 + $0xf8] sm:$0xff]  ;;  %v758_v20 = vld [vmem:[%s989_s4 + $0xf0] sm:$0xff] }
   0x6   :  { %426 = vmatpush.bf16.msra.mxu1 %v734_v3  ;;  %v724_v13 = vld [vmem:[%s990_s3] sm:$0xff]  ;;  %v731_v18 = vld [vmem:[%s989_s4 + $0x18] sm:$0xff]  ;;  %v730_v23 = vld [vmem:[%s989_s4 + $0x10] sm:$0xff] }
   0x7   :  { %81 = vmatpush.bf16.msra.mxu0 %v726_v4  ;;  %v740_v15 = vld [vmem:[%s989_s4 + $0x60] sm:$0xff]  ;;  %v739_v21 = vld [vmem:[%s989_s4 + $0x58] sm:$0xff]  ;;  %v757_v24 = vld [vmem:[%s989_s4 + $0xe8] sm:$0xff] }
   0x8   :  { %439 = vmatpush.bf16.msra.mxu2 %v742_v6  ;;  %v92_v16 = vld [vmem:[%s991_s1] sm:$0x1f]  ;;  %v747_v22 = vld [vmem:[%s989_s4 + $0x98] sm:$0xff]  ;;  %v738_v25 = vld [vmem:[%s989_s4 + $0x50] sm:$0xff] }
   0x9   :  { %452 = vmatpush.bf16.msra.mxu3 %v750_v7  ;;  %v748_v17 = vld [vmem:[%s989_s4 + $0xa0] sm:$0xff]  ;;  %174 = vst [vmem:[#allocation1] ss:$9 sm:$0xff] %v92_v16  ;;  %v746_v26 = vld [vmem:[%s989_s4 + $0x90] sm:$0xff]  ;;  %v729_v27 = vld [vmem:[%s989_s4 + $0x8] sm:$0xff] }
   0xa   :  { %427 = vmatpush.bf16.msra.mxu1 %v733_v8  ;;  %v39_v19 = vld [vmem:[%s992_s0] sm:$0x1]  ;;  %v737_v29 = vld [vmem:[%s989_s4 + $0x48] sm:$0xff]  ;;  %v767_v32 = vld [vmem:[%s989_s4 + $0x138] sm:$0xff] }
   0xb   :  { %82 = vmatpush.bf16.msra.mxu0 %v725_v9  ;;  %v756_v28 = vld [vmem:[%s989_s4 + $0xe0] sm:$0xff]  ;;  %v745_v30 = vld [vmem:[%s989_s4 + $0x88] sm:$0xff]  ;;  %v755_v33 = vld [vmem:[%s989_s4 + $0xd8] sm:$0xff] }
   0xc   :  { %440 = vmatpush.bf16.msra.mxu2 %v741_v10  ;;  %v728_v31 = vld [vmem:[%s989_s4] sm:$0xff]  ;;  %v766_v37 = vld [vmem:[%s989_s4 + $0x130] sm:$0xff]  ;;  %v765_v46 = vld [vmem:[%s989_s4 + $0x128] sm:$0xff] }
   0xd   :  { %453 = vmatpush.bf16.msra.mxu3 %v749_v11  ;;  %v736_v34 = vld [vmem:[%s989_s4 + $0x40] sm:$0xff]  ;;  %v754_v38 = vld [vmem:[%s989_s4 + $0xd0] sm:$0xff]  ;;  %v753_v47 = vld [vmem:[%s989_s4 + $0xc8] sm:$0xff] }
   0xe   :  { %428 = vmatpush.bf16.msra.mxu1 %v732_v12  ;;  %v744_v35 = vld [vmem:[%s989_s4 + $0x80] sm:$0xff]  ;;  %v763_v52 = vld [vmem:[%s989_s4 + $0x118] sm:$0xff]  ;;  %v762_v54 = vld [vmem:[%s989_s4 + $0x110] sm:$0xff] }
   0xf   :  { %83 = vmatpush.bf16.msra.mxu0 %v724_v13  ;;  %v495_v39 = vld [vmem:[%s993_s2] sm:$0x3]  ;;  %v761_v55 = vld [vmem:[%s989_s4 + $0x108] sm:$0xff] }
  0x10   :  { %441 = vmatpush.bf16.msra.mxu2 %v740_v15  ;;  %v175_v36 = vld [vmem:[#allocation1] sm:$0xff]  ;;  %v176_v41 = vld [vmem:[#allocation1 + $0x9] sm:$0xff]  ;;  %v177_v42 = vld [vmem:[#allocation1 + $0x12] sm:$0xff]  ;;  %505 = vperm.xlu0 %771, %v495_v39  }
  0x11   :  { %454 = vmatpush.bf16.msra.mxu3 %v748_v17  ;;  %v529_v44 = vld [vmem:[%s994_s8] sm:$0x3]  ;;  %v179_v57 = vld [vmem:[#allocation1 + $0x24] sm:$0xff] }
  0x12   :  { %561 = vmatmul.msk.bf16.vlgmr.msra.gmra.mxu0 %vm72_vm0, %v39_v19  ;;  %429 = vmatpush.bf16.msra.mxu1 %v731_v18  ;;  %v518_v45 = vld [vmem:[%s995_s7] sm:$0x3]  ;;  %776 = vrcp.f32 %v529_v44  ;;  %v38_v58 = vld [vmem:[#allocation2] sm:$0x3] }
  0x13   :  { %464 = vmatpush.bf16.msrb.mxu0 %v759_v14  ;;  %521 = vperm.xlu1 %773, %v518_v45   ;;  %v764_v48 = vld [vmem:[%s989_s4 + $0x120] sm:$0xff] }
  0x14   :  { %442 = vmatpush.bf16.msra.mxu2 %v739_v21  ;;  %v752_v49 = vld [vmem:[%s989_s4 + $0xc0] sm:$0xff] }
  0x15   :  { %455 = vmatpush.bf16.msra.mxu3 %v747_v22  ;;  %v178_v53 = vld [vmem:[#allocation1 + $0x1b] sm:$0xff] }
  0x16   :  { %430 = vmatpush.bf16.msra.mxu1 %v730_v23  ;;  %v760_v56 = vld [vmem:[%s989_s4 + $0x100] sm:$0xff] }
  0x17   :  { %465 = vmatpush.bf16.msrb.mxu0 %v758_v20  ;;  %v496_v14 = vld [vmem:[%s997_s5] sm:$0x3] }
  0x18   :  { %443 = vmatpush.bf16.msra.mxu2 %v738_v25  ;;  %v777_v50 = vpop.eup %776  ;;  %772 = vset.pattern.permute.xlu0 %v782_v51  ;;  %v775_v16 = vld [vmem:[%s996_s6] ss:$0 sm:$0xff]  ;;  %v508_v17 = vperm.slane %v496_v14, 0  ;;  %v515_v18 = vperm.slane %v496_v14, 1 }
  0x19   :  { %456 = vmatpush.bf16.msra.mxu3 %v746_v26  ;;  %512 = vperm.xlu0 %772, %v495_v39  }
  0x1a   :  { %431 = vmatpush.bf16.msra.mxu1 %v729_v27 }
  0x1b   :  { %466 = vmatpush.bf16.msrb.mxu0 %v757_v24  ;;  %533 = vperm.xlu1 %773, %v777_v50  }
  0x1c   :  { %444 = vmatpush.bf16.msra.mxu2 %v737_v29 }
  0x1d   :  { %457 = vmatpush.bf16.msra.mxu3 %v745_v30 }
  0x1e   :  { %432 = vmatpush.bf16.msra.mxu1 %v728_v31 }
  0x1f   :  { %467 = vmatpush.bf16.msrb.mxu0 %v756_v28 }
  0x20   :  { %445 = vmatpush.bf16.msra.mxu2 %v736_v34 }
  0x21   :  { %458 = vmatpush.bf16.msra.mxu3 %v744_v35  ;;  %433 = vmatmul.bf16.vlgmr.msra.gmra.mxu1 %v175_v36 }
  0x22   :  { %477 = vmatpush.bf16.msrb.mxu1 %v767_v32  ;;  %774 = vset.pattern.permute.xlu0 %v781_v43 }
  0x23   :  { %468 = vmatpush.bf16.msrb.mxu0 %v755_v33  ;;  %446 = vmatmul.bf16.vlgmr.msra.gmra.mxu2 %v176_v41 }
  0x24   :  { %459 = vmatmul.bf16.vlgmr.msra.gmra.mxu3 %v177_v42 }
  0x26   :  { %478 = vmatpush.bf16.msrb.mxu1 %v766_v37 }
  0x27   :  { %469 = vmatpush.bf16.msrb.mxu0 %v754_v38 }
  0x2a   :  { %479 = vmatpush.bf16.msrb.mxu1 %v765_v46 }
  0x2b   :  { %470 = vmatpush.bf16.msrb.mxu0 %v753_v47 }
  0x2e   :  { %480 = vmatpush.bf16.msrb.mxu1 %v764_v48 }
  0x2f   :  { %471 = vmatpush.bf16.msrb.mxu0 %v752_v49 }
  0x32   :  { %472 = vmatmul.bf16.vlgmr.msrb.gmra.mxu0 %v178_v53  ;;  %481 = vmatpush.bf16.msrb.mxu1 %v763_v52 }
  0x36   :  { %482 = vmatpush.bf16.msrb.mxu1 %v762_v54 }
  0x3a   :  { %483 = vmatpush.bf16.msrb.mxu1 %v761_v55 }
  0x3e   :  { %484 = vmatpush.bf16.msrb.mxu1 %v760_v56 }
  0x41   :  { %485 = vmatmul.bf16.vlgmr.msrb.gmra.mxu1 %v179_v57 }
  0x82   :  { %v506_v10 = vpop.permute.xlu0 %505 }
  0x83   :  { %v509_v22 = vmul.f32 %v508_v17, %v506_v10 }
  0x85   :  { %v522_v26 = vpop.permute.xlu1 %521 }
  0x8b   :  { %v513_v19 = vpop.permute.xlu0 %512 }
  0x8c   :  { %v516_v23 = vmul.f32 %v515_v18, %v513_v19 }
  0x8d   :  { %v534_v32 = vpop.permute.xlu1 %533 }
  0x8f   :  { %v85_v59 = vpop.f32.mrf.mxu0 }
  0x90   :  { %v89_v60 = vadd.f32 %v85_v59, %v38_v58 }
  0x92   :  { %90 = vst [vmem:[#allocation2] sm:$0x3] %v89_v60 }
  0x97   :  { %v87_v61 = vpop.f32.mrf.mxu0 }
  0x99   :  { %v91_v12 = vld [vmem:[#allocation2] sm:$0x3] }
  0x9e   :  { %v434_v62 = vpop.f32.mrf.mxu1 }
  0xa6   :  { %v436_v63 = vpop.f32.mrf.mxu1  ;;  %v447_v0 = vpop.f32.mrf.mxu2 }
  0xa7   :  { %v460_v1 = vpop.f32.mrf.mxu3  ;;  %v448_v5 = vadd.f32 %v447_v0, %v434_v62 }
  0xa9   :  { %v461_v7 = vadd.f32 %v460_v1, %v448_v5 }
  0xae   :  { %v449_v3 = vpop.f32.mrf.mxu2 }
  0xaf   :  { %v473_v2 = vpop.f32.mrf.mxu0  ;;  %v462_v4 = vpop.f32.mrf.mxu3 }
  0xb0   :  { %v474_v8 = vadd.f32 %v473_v2, %v461_v7 }
  0xb7   :  { %v475_v6 = vpop.f32.mrf.mxu0 }
  0xbe   :  { %v486_v9 = vpop.f32.mrf.mxu1 }
  0xbf   :  { %v487_v11 = vadd.f32 %v486_v9, %v474_v8 }
  0xc1   :  { %v490_v13 = vadd.f32 %v487_v11, %v91_v12 }
  0xc3   :  { %491 = vst [vmem:[#allocation2] sm:$0x3] %v490_v13 }
  0xc6   :  { %v488_v15 = vpop.f32.mrf.mxu1 }
  0xca   :  { %v497_v20 = vld [vmem:[#allocation2] sm:$0x3] }
  0xcb   :  { %v502_v21 = vadd.f32 %v775_v16, %v497_v20 }
  0xcd   :  { %v510_v24 = vadd.f32 %v509_v22, %v502_v21 }
  0xcf   :  { %v517_v25 = vadd.f32 %v516_v23, %v510_v24 }
  0xd1   :  { %v524_v27 = vsub.f32 %v522_v26, %v517_v25 }
  0xd3   :  { %v525_v28 = vmul.f32 -0.5, %v524_v27 }
  0xd5   :  { %v526_v29 = vmul.f32 %v525_v28, %v524_v27 }
  0xd7   :  { %v722_v30 = vadd.f32 -0.9189385, %v526_v29 }
  0xd9   :  { %v723_v31 = vadd.f32 0.6931472, %v722_v30 }
  0xdb   :  { %v536_v33 = vmul.f32 %v723_v31, %v534_v32 }
  0xdd   :  { %v537_v34 = vmul.f32 1.442695, %v536_v33 }
  0xdf   :  { %778 = vpow2.f32 %v537_v34 }
  0xe5   :  { %v779_v35 = vpop.eup %778 }
  0xe6   :  { %v539_v36 = vsub.f32 1.0, %v779_v35 }
  0xe8   :  { %540 = vst [vmem:[%s998_s9] sm:$0x3] %v539_v36 }

</bundles_post_ra>
